<compile_context>
chip_gen: v7x
topology: tpu7x:2x2x1
jax: 0.10.0
libtpu: 0.0.40
codegen_flags: <defaults>
</compile_context>

<pallas_src>
import functools
import math

import jax
import jax.numpy as jnp
from jax import lax
from jax.experimental import pallas as pl
from jax.experimental.pallas import tpu as pltpu

# Conservative, generation-portable VMEM budget: v5e/v6e have 128 MiB physical
# VMEM (16/32 MiB default scoped), v7x only 64 MiB per TensorCore.  24 MiB of
# payload + 4 MiB headroom (set explicitly via vmem_limit_bytes) fits them all.
_DEFAULT_VMEM_BUDGET = 24 * 1024 * 1024
_VMEM_HEADROOM = 4 * 1024 * 1024
_MAX_TOKEN_TILE = 512   # amortizes the ~0.35us per-grid-step overhead
_UNROLL = 8             # co-schedules id load / clamp / copy issue for 8 rows


def _choose_token_tile(num_tokens, dim, itemsize, avail_vmem_bytes):
    """Largest sublane-aligned token tile whose double-buffered output block fits
    `avail_vmem_bytes`, shrunk so the grid has >= 2 tiles when the token count
    allows it (lets the v7x megacore split the gather across both cores)."""
    per_row_bytes = 2 * dim * itemsize          # x2: the pipeline double-buffers out
    tt = int(min(_MAX_TOKEN_TILE, max(8, avail_vmem_bytes // per_row_bytes)))
    tt = max(8, (tt // 8) * 8)                  # sublane-aligned block
    while tt > 8 and (num_tokens + tt - 1) // tt < 2:
        tt = max(8, (tt // 2 // 8) * 8)
    return tt


def _gather_vmem_table_kernel(ids_ref, table_ref, out_ref, *, token_tile,
                              num_tokens):
    """Fast path: whole table is VMEM-resident; gather rows with vector slices."""
    base = pl.program_id(0) * token_tile
    vocab = table_ref.shape[0]

    def copy_row(j, carry):
        def do():
            # TODO(synk): torch.nn.Embedding raises on out-of-range ids; we
            # clamp instead (cannot raise from inside a TPU kernel).
            tok = jnp.clip(ids_ref[base + j], 0, vocab - 1)
            out_ref[pl.ds(j, 1), :] = table_ref[pl.ds(tok, 1), :]
        if num_tokens is None:            # no padded tail -> no per-row guard
            do()
        else:
            pl.when(base + j < num_tokens)(do)
        return carry

    lax.fori_loop(0, token_tile, copy_row, 0, unroll=_UNROLL)


def _gather_hbm_table_kernel(ids_ref, table_hbm, out_ref, copy_sem, *,
                             token_tile, num_tokens):
    """Slow path: table too big for VMEM.  HBM row gather DMA'd directly into
    the output block (no VMEM staging buffer), one shared DMA semaphore."""
    base = pl.program_id(0) * token_tile
    vocab = table_hbm.shape[0]

    # Phase 1: issue every row DMA of this tile; they run concurrently and all
    # signal the single shared DMA semaphore.
    def issue(j, carry):
        def do():
            tok = jnp.clip(ids_ref[base + j], 0, vocab - 1)
            pltpu.make_async_copy(
                table_hbm.at[pl.ds(tok, 1), :],
                out_ref.at[pl.ds(j, 1), :],
                copy_sem,
            ).start()
        if num_tokens is None:
            do()
        else:
            pl.when(base + j < num_tokens)(do)
        return carry

    lax.fori_loop(0, token_tile, issue, 0, unroll=_UNROLL)

    # Phase 2: drain the shared semaphore.  Each wait is shape-matched to one
    # issued row copy, so once the loop finishes every issued copy has landed.
    # (A DMA wait only inspects the semaphore + dst size; the src slice is
    #  irrelevant — row 0 just keeps the descriptor shapes matched.  We keep
    #  per-row waits rather than one aggregate whole-tile wait to avoid relying
    #  on byte-counting semantics; this is the pattern proven by the upstream
    #  paged-attention MultiPage copy descriptor.)
    def drain(j, carry):
        def do():
            pltpu.make_async_copy(
                table_hbm.at[pl.ds(0, 1), :],
                out_ref.at[pl.ds(j, 1), :],
                copy_sem,
            ).wait()
        if num_tokens is None:
            do()
        else:
            pl.when(base + j < num_tokens)(do)
        return carry

    lax.fori_loop(0, token_tile, drain, 0, unroll=_UNROLL)


def embeddings_forward(ids, table, *, vmem_budget_bytes=_DEFAULT_VMEM_BUDGET):
    """Pallas equivalent of Embeddings.forward: returns table[ids]."""
    v, d = table.shape
    itemsize = jnp.dtype(table.dtype).itemsize
    ids_shape = tuple(ids.shape)
    t = math.prod(ids_shape)

    # Fast path requires the resident table + a minimal double-buffered out
    # tile to fit the budget.
    table_bytes = v * d * itemsize
    min_out_bytes = 2 * 8 * d * itemsize
    use_resident_table = (table_bytes + min_out_bytes) <= vmem_budget_bytes

    avail = vmem_budget_bytes - (table_bytes if use_resident_table else 0)
    tt = _choose_token_tile(t, d, itemsize, avail)
    n_tiles = pl.cdiv(t, tt)
    t_pad = tt * n_tiles

    ids_flat = ids.reshape(t).astype(jnp.int32)
    if t_pad != t:
        # Padded slots are never gathered (tail guard inside the kernel); the
        # padded output rows are sliced off below.
        ids_flat = jnp.pad(ids_flat, (0, t_pad - t))
    num_tokens = None if t_pad == t else t

    vmem_limit = int(max(vmem_budget_bytes, _DEFAULT_VMEM_BUDGET) + _VMEM_HEADROOM)
    cparams = pltpu.CompilerParams(
        dimension_semantics=("parallel",),   # token tiles are independent
        vmem_limit_bytes=vmem_limit)
    out_shape = jax.ShapeDtypeStruct((t_pad, d), table.dtype)
    out_spec = pl.BlockSpec((tt, d), lambda i, ids_ref: (i, 0))

    if use_resident_table:
        kernel = functools.partial(_gather_vmem_table_kernel,
                                   token_tile=tt, num_tokens=num_tokens)
        grid_spec = pltpu.PrefetchScalarGridSpec(
            num_scalar_prefetch=1,                           # ids -> SMEM
            grid=(n_tiles,),
            in_specs=[pl.BlockSpec((v, d), lambda i, ids_ref: (0, 0))],  # table resident in VMEM
            out_specs=out_spec)
    else:
        kernel = functools.partial(_gather_hbm_table_kernel,
                                   token_tile=tt, num_tokens=num_tokens)
        grid_spec = pltpu.PrefetchScalarGridSpec(
            num_scalar_prefetch=1,                           # ids -> SMEM
            grid=(n_tiles,),
            in_specs=[pl.BlockSpec(memory_space=pl.ANY)],    # table stays in HBM
            out_specs=out_spec,
            scratch_shapes=[pltpu.SemaphoreType.DMA(())])    # ONE shared DMA sem

    out = pl.pallas_call(
        kernel, out_shape=out_shape, grid_spec=grid_spec,
        compiler_params=cparams,
    )(ids_flat, table)

    return out[:t].reshape(*ids_shape, d)


if __name__ == "__main__":
    # Module hyper-parameters (small, consistent with the forward pass).
    vocab_size, dim_emb, emb_var = 32, 128, 1e-4
    batch, seq = 2, 8

    key = jax.random.PRNGKey(0)
    k_w, k_ids = jax.random.split(key)

    # Deterministic stand-in for torch.manual_seed(3); weight.normal_(0, emb_var)
    # uses emb_var as the std, matched here by scaling a standard normal.
    table = (emb_var * jax.random.normal(k_w, (vocab_size, dim_emb))).astype(jnp.float32)
    ids = jax.random.randint(k_ids, (batch, seq), 0, vocab_size, dtype=jnp.int32)

    # Reference semantics: torch.nn.Embedding(ids) == table[ids]
    ref = jnp.take(table, ids, axis=0)

    # Fast path: the 16 KiB demo table is VMEM-resident.
    out = embeddings_forward(ids, table)
    out = jax.block_until_ready(out)
    assert out.shape == (batch, seq, dim_emb)
    assert out.dtype == jnp.float32
    assert jnp.array_equal(out, ref), "fast (VMEM-resident) path mismatch"

    # Slow path: force the manual HBM row-gather branch (shrunk VMEM budget)
    # so the DMA path is also exercised and verified on-device.
    out_hbm = embeddings_forward(ids, table, vmem_budget_bytes=1024)
    out_hbm = jax.block_until_ready(out_hbm)
    assert jnp.array_equal(out_hbm, ref), "slow (HBM gather) path mismatch"

    print("KERNEL_OK")
</pallas_src>

<mosaic_0001>
module attributes {stable_mosaic.version = 11 : i64} {
  func.func @_gather_vmem_table_kernel(%arg0: i32, %arg1: memref<16xi32, #tpu.memory_space<smem>>, %arg2: memref<32x128xf32, #tpu.memory_space<vmem>>, %arg3: memref<8x128xf32, #tpu.memory_space<vmem>>) attributes {dimension_semantics = [#tpu.dimension_semantics<parallel>], iteration_bounds = array<i64: 2>, scalar_prefetch = 1 : i64, scratch_operands = 0 : i64, tpu.core_type = #tpu.core_type<tc>, window_params = [{pipeline_mode = #tpu.pipeline_mode<synchronous>, transform_indices = @transform_0, window_bounds = array<i64: 32, 128>}, {transform_indices = @transform_1, window_bounds = array<i64: 8, 128>}]} {
    %c8_i32 = arith.constant 8 : i32
    %0 = arith.muli %arg0, %c8_i32 : i32
    %c0_i32 = arith.constant 0 : i32
    %1 = arith.addi %0, %c0_i32 : i32
    %2 = arith.index_cast %1 : i32 to index
    %3 = memref.load %arg1[%2] : memref<16xi32, #tpu.memory_space<smem>>
    %c0_i32_0 = arith.constant 0 : i32
    %c31_i32 = arith.constant 31 : i32
    %4 = arith.maxsi %c0_i32_0, %3 : i32
    %5 = arith.minsi %c31_i32, %4 : i32
    %6 = arith.index_cast %5 : i32 to index
    %c0 = arith.constant 0 : index
    %7 = vector.load %arg2[%6, %c0] : memref<32x128xf32, #tpu.memory_space<vmem>>, vector<1x128xf32>
    %8 = arith.index_cast %c0_i32 : i32 to index
    %c0_1 = arith.constant 0 : index
    %9 = vector.load %arg3[%8, %c0_1] : memref<8x128xf32, #tpu.memory_space<vmem>>, vector<1x128xf32>
    tpu.vector_store %arg3[%8, %c0_1], %7 {strides = array<i32>} : memref<8x128xf32, #tpu.memory_space<vmem>>, vector<1x128xf32>,
    %c1_i32 = arith.constant 1 : i32
    %10 = arith.addi %0, %c1_i32 : i32
    %11 = arith.index_cast %10 : i32 to index
    %12 = memref.load %arg1[%11] : memref<16xi32, #tpu.memory_space<smem>>
    %c0_i32_2 = arith.constant 0 : i32
    %c31_i32_3 = arith.constant 31 : i32
    %13 = arith.maxsi %c0_i32_2, %12 : i32
    %14 = arith.minsi %c31_i32_3, %13 : i32
    %15 = arith.index_cast %14 : i32 to index
    %c0_4 = arith.constant 0 : index
    %16 = vector.load %arg2[%15, %c0_4] : memref<32x128xf32, #tpu.memory_space<vmem>>, vector<1x128xf32>
    %17 = arith.index_cast %c1_i32 : i32 to index
    %c0_5 = arith.constant 0 : index
    %18 = vector.load %arg3[%17, %c0_5] : memref<8x128xf32, #tpu.memory_space<vmem>>, vector<1x128xf32>
    tpu.vector_store %arg3[%17, %c0_5], %16 {strides = array<i32>} : memref<8x128xf32, #tpu.memory_space<vmem>>, vector<1x128xf32>,
    %c2_i32 = arith.constant 2 : i32
    %19 = arith.addi %0, %c2_i32 : i32
    %20 = arith.index_cast %19 : i32 to index
    %21 = memref.load %arg1[%20] : memref<16xi32, #tpu.memory_space<smem>>
    %c0_i32_6 = arith.constant 0 : i32
    %c31_i32_7 = arith.constant 31 : i32
    %22 = arith.maxsi %c0_i32_6, %21 : i32
    %23 = arith.minsi %c31_i32_7, %22 : i32
    %24 = arith.index_cast %23 : i32 to index
    %c0_8 = arith.constant 0 : index
    %25 = vector.load %arg2[%24, %c0_8] : memref<32x128xf32, #tpu.memory_space<vmem>>, vector<1x128xf32>
    %26 = arith.index_cast %c2_i32 : i32 to index
    %c0_9 = arith.constant 0 : index
    %27 = vector.load %arg3[%26, %c0_9] : memref<8x128xf32, #tpu.memory_space<vmem>>, vector<1x128xf32>
    tpu.vector_store %arg3[%26, %c0_9], %25 {strides = array<i32>} : memref<8x128xf32, #tpu.memory_space<vmem>>, vector<1x128xf32>,
    %c3_i32 = arith.constant 3 : i32
    %28 = arith.addi %0, %c3_i32 : i32
    %29 = arith.index_cast %28 : i32 to index
    %30 = memref.load %arg1[%29] : memref<16xi32, #tpu.memory_space<smem>>
    %c0_i32_10 = arith.constant 0 : i32
    %c31_i32_11 = arith.constant 31 : i32
    %31 = arith.maxsi %c0_i32_10, %30 : i32
    %32 = arith.minsi %c31_i32_11, %31 : i32
    %33 = arith.index_cast %32 : i32 to index
    %c0_12 = arith.constant 0 : index
    %34 = vector.load %arg2[%33, %c0_12] : memref<32x128xf32, #tpu.memory_space<vmem>>, vector<1x128xf32>
    %35 = arith.index_cast %c3_i32 : i32 to index
    %c0_13 = arith.constant 0 : index
    %36 = vector.load %arg3[%35, %c0_13] : memref<8x128xf32, #tpu.memory_space<vmem>>, vector<1x128xf32>
    tpu.vector_store %arg3[%35, %c0_13], %34 {strides = array<i32>} : memref<8x128xf32, #tpu.memory_space<vmem>>, vector<1x128xf32>,
    %c4_i32 = arith.constant 4 : i32
    %37 = arith.addi %0, %c4_i32 : i32
    %38 = arith.index_cast %37 : i32 to index
    %39 = memref.load %arg1[%38] : memref<16xi32, #tpu.memory_space<smem>>
    %c0_i32_14 = arith.constant 0 : i32
    %c31_i32_15 = arith.constant 31 : i32
    %40 = arith.maxsi %c0_i32_14, %39 : i32
    %41 = arith.minsi %c31_i32_15, %40 : i32
    %42 = arith.index_cast %41 : i32 to index
    %c0_16 = arith.constant 0 : index
    %43 = vector.load %arg2[%42, %c0_16] : memref<32x128xf32, #tpu.memory_space<vmem>>, vector<1x128xf32>
    %44 = arith.index_cast %c4_i32 : i32 to index
    %c0_17 = arith.constant 0 : index
    %45 = vector.load %arg3[%44, %c0_17] : memref<8x128xf32, #tpu.memory_space<vmem>>, vector<1x128xf32>
    tpu.vector_store %arg3[%44, %c0_17], %43 {strides = array<i32>} : memref<8x128xf32, #tpu.memory_space<vmem>>, vector<1x128xf32>,
    %c5_i32 = arith.constant 5 : i32
    %46 = arith.addi %0, %c5_i32 : i32
    %47 = arith.index_cast %46 : i32 to index
    %48 = memref.load %arg1[%47] : memref<16xi32, #tpu.memory_space<smem>>
    %c0_i32_18 = arith.constant 0 : i32
    %c31_i32_19 = arith.constant 31 : i32
    %49 = arith.maxsi %c0_i32_18, %48 : i32
    %50 = arith.minsi %c31_i32_19, %49 : i32
    %51 = arith.index_cast %50 : i32 to index
    %c0_20 = arith.constant 0 : index
    %52 = vector.load %arg2[%51, %c0_20] : memref<32x128xf32, #tpu.memory_space<vmem>>, vector<1x128xf32>
    %53 = arith.index_cast %c5_i32 : i32 to index
    %c0_21 = arith.constant 0 : index
    %54 = vector.load %arg3[%53, %c0_21] : memref<8x128xf32, #tpu.memory_space<vmem>>, vector<1x128xf32>
    tpu.vector_store %arg3[%53, %c0_21], %52 {strides = array<i32>} : memref<8x128xf32, #tpu.memory_space<vmem>>, vector<1x128xf32>,
    %c6_i32 = arith.constant 6 : i32
    %55 = arith.addi %0, %c6_i32 : i32
    %56 = arith.index_cast %55 : i32 to index
    %57 = memref.load %arg1[%56] : memref<16xi32, #tpu.memory_space<smem>>
    %c0_i32_22 = arith.constant 0 : i32
    %c31_i32_23 = arith.constant 31 : i32
    %58 = arith.maxsi %c0_i32_22, %57 : i32
    %59 = arith.minsi %c31_i32_23, %58 : i32
    %60 = arith.index_cast %59 : i32 to index
    %c0_24 = arith.constant 0 : index
    %61 = vector.load %arg2[%60, %c0_24] : memref<32x128xf32, #tpu.memory_space<vmem>>, vector<1x128xf32>
    %62 = arith.index_cast %c6_i32 : i32 to index
    %c0_25 = arith.constant 0 : index
    %63 = vector.load %arg3[%62, %c0_25] : memref<8x128xf32, #tpu.memory_space<vmem>>, vector<1x128xf32>
    tpu.vector_store %arg3[%62, %c0_25], %61 {strides = array<i32>} : memref<8x128xf32, #tpu.memory_space<vmem>>, vector<1x128xf32>,
    %c7_i32 = arith.constant 7 : i32
    %64 = arith.addi %0, %c7_i32 : i32
    %65 = arith.index_cast %64 : i32 to index
    %66 = memref.load %arg1[%65] : memref<16xi32, #tpu.memory_space<smem>>
    %c0_i32_26 = arith.constant 0 : i32
    %c31_i32_27 = arith.constant 31 : i32
    %67 = arith.maxsi %c0_i32_26, %66 : i32
    %68 = arith.minsi %c31_i32_27, %67 : i32
    %69 = arith.index_cast %68 : i32 to index
    %c0_28 = arith.constant 0 : index
    %70 = vector.load %arg2[%69, %c0_28] : memref<32x128xf32, #tpu.memory_space<vmem>>, vector<1x128xf32>
    %71 = arith.index_cast %c7_i32 : i32 to index
    %c0_29 = arith.constant 0 : index
    %72 = vector.load %arg3[%71, %c0_29] : memref<8x128xf32, #tpu.memory_space<vmem>>, vector<1x128xf32>
    tpu.vector_store %arg3[%71, %c0_29], %70 {strides = array<i32>} : memref<8x128xf32, #tpu.memory_space<vmem>>, vector<1x128xf32>,
    %c8_i32_30 = arith.constant 8 : i32
    return
  }
  func.func @transform_0(%arg0: i32, %arg1: memref<16xi32, #tpu.memory_space<smem>>) -> (i32, i32) {
    %c0_i32 = arith.constant 0 : i32
    %c0_i32_0 = arith.constant 0 : i32
    %c0_i32_1 = arith.constant 0 : i32
    return %c0_i32, %c0_i32_0 : i32, i32
  }
  func.func @transform_1(%arg0: i32, %arg1: memref<16xi32, #tpu.memory_space<smem>>) -> (i32, i32) {
    %c0_i32 = arith.constant 0 : i32
    %c0_i32_0 = arith.constant 0 : i32
    return %arg0, %c0_i32 : i32, i32
  }
}

</mosaic_0001>

<bundles_post_ra>
// kernel: tpu_custom_call.1
= control target key start
LH: loop header
LB: loop body
LE: loop exit
PB: predicated region body
PF: predicated region fallthrough
CT: control target
= control target key end

     0   :  { %s698_s0 = inlined_call_operand.hbm [shape: s32[16], index: 0, kind: input, shape index: {}]   ;;  %s699_s1 = inlined_call_operand.hbm [shape: f32[32,128], index: 1, kind: input, shape index: {}]   ;;  %s700_s2 = inlined_call_operand.hbm [shape: f32[16,128], index: 2, kind: output, shape index: {}]  }
   0x1   :  { %s388_s11 = scalar_lea.hbm %s698_s0, 16 }
   0x2   :  { %p389_p0 = scmp.ne.s32.totalorder %s698_s0, %s388_s11  ;;  %p392_p1 = scmp.lt.u32.totalorder %s388_s11, %s698_s0 }
   0x4   :  { %p394_p2 = pnand %p392_p1, %p389_p0 }
   0x6   :  { %397 = shalt.err (!%p394_p2)  }
   0x7   :  { %s496_s16 = smov [#allocation3]  }
   0x8   :  { %8 = dma.hbm_to_smem %s698_s0, 16, %s496_s16, [#allocation2] }
   0x9   :  { %470 = dma.done.wait [#allocation2], 16 }
   0xa   :  { %471 = vsyncadd [#allocation2], 4294967280 }
   0xb   :  { %10 = sfence }
   0xc   :  { %11 = vsyncpa [#allocation5], 0 }
   0xd   :  { %12 = vsyncpa [#allocation6], 0 }
   0xe   :  { %14 = vsyncpa [#allocation6 + $0x1], 0  ;;  %s528_s19 = smov 0   ;;  %s530_s20 = smov 0  }
   0xf   :  { %s532_s21 = smov 0   ;;  %s534_s22 = smov 0  }
  0x10 LB: > { %s549_s0 = sadd.s32 4294967295, %s494_s22   ;;  %s268_s23 = sadd.s32 4294967294, %s494_s22   ;;  %s494_s22 = sphi %s534_s22, %s716_s22   ;;  %s490_s21 = sphi %s532_s21, %s715_s21   ;;  %s486_s20 = sphi %s530_s20, %s714_s20   ;;  %s482_s19 = sphi %s528_s19, %s713_s19  }
  0x11   : > { %s553_s24 = sadd.s32 1, %s494_s22   ;;  %s48_s25 = sadd.s32 1, %s490_s21 }
  0x12   : > { %s45_s26 = ssub.s32 %s494_s22, %s553_s24  ;;  %p58_p3 = scmp.ne.s32.totalorder %s490_s21, %s486_s20 }
  0x13   : > { %p46_p4 = scmp.eq.s32.totalorder %s45_s26, 0  ;;  %p59_p5 = scmp.eq.s32.totalorder %s549_s0, 1 }
  0x14   : > { %p64_p6 = scmp.ne.s32.totalorder %s486_s20, %s482_s19  ;;  %p65_p7 = scmp.eq.s32.totalorder %s268_s23, 1 }
  0x15   : > { %s564_s27 = scalar_select %p46_p4, %s490_s21, %s48_s25  }
  0x16   : > { %p566_p8 = por %p59_p5, %p58_p3  ;;  %p570_p9 = por %p65_p7, %p64_p6 }
  0x17   : > { %p269_p10 = scmp.ge.s32.totalorder %s494_s22, 1  ;;  %p72_p11 = scmp.lt.s32.totalorder %s494_s22, 3 }
  0x18   : > { %s704_s28 = scalar_select %p566_p8, 1, 0 }
  0x19   : > { %s705_s29 = scalar_select %p570_p9, 1, 0 }
  0x1a   : > { %p701_p12 = scmp.eq.s32.totalorder %s549_s0, 0  ;;  %p577_p13 = pnand %p269_p10, %p72_p11 }
  0x1b   : > { %s497_s3 = smov [#allocation4]   ;;  %s398_s8 = scalar_lea.hbm %s699_s1, 512 }
  0x1c   : > { %s706_s30 = scalar_select %p577_p13, 1, 0 }
  0x1d   : > { %s84_s4 = sshll.u32 %s497_s3, 4  ;;  %p341_p0 = pneg %p577_p13  ;;  %s85_s4 = int_to_ptr.vmem [resolvable:$true] %s84_s4 }
  0x1e   : > { %p399_p2 = scmp.ne.s32.totalorder %s699_s1, %s398_s8  ;;  %p405_p6 = scmp.lt.u32.totalorder %s398_s8, %s699_s1 }
  0x1f   : > { %p585_p1 = pnand %p701_p12, %p341_p0 }
  0x21   : > { %p400_p3 = pneg %p585_p1 }
  0x23   : > { %p401_p4 = pnand %p400_p3, %p399_p2 }
  0x25   : > { %p402_p5 = pneg %p401_p4 }
  0x27   : > { %p407_p7 = pnand %p405_p6, %p402_p5 }
  0x29   : > { %410 = shalt.err (!%p407_p7)
}
  0x2a   : > { %s411_s13 = scalar_lea.vmem %s85_s4, 512  ;;  %p419_p12 = scmp.lt.s32.totalorder %s85_s4, %s85_s4 }
  0x2b   : > { %p412_p10 = scmp.ne.s32.totalorder %s85_s4, %s411_s13  ;;  %p420_p9 = scmp.lt.s32.totalorder %s411_s13, %s411_s13 }
  0x2d   : > { %p414_p11 = pnand %p412_p10, %p400_p3  ;;  %p421_p8 = por %p420_p9, %p419_p12 }
  0x2f   : > { %p415_p0 = pneg %p414_p11 }
  0x31   : > { %p422_p13 = pnand %p421_p8, %p415_p0 }
  0x33   : > { %425 = shalt.err (!%p422_p13)
}
  0x34   : > { %s498_s14 = smov 128   ;;  %s499_s15 = smov 8  }
  0x35   : > { %344 = dma.hbm_to_vmem [thread:$0]  (!%p585_p1), %s699_s1, 512, %s85_s4, [#allocation5], %s498_s14, %s498_s14, %s499_s15  }
  0x36   : > { %p708_p2 = scmp.ne.s32.totalorder %s706_s30, 0 }
  0x37   : > { %p709_p4 = scmp.eq.s32.totalorder (!%p708_p2), %s549_s0, 0 }
  0x38   : > { %100 = sbr.rel (%p708_p2) target bundleno = 120 (0x78), region = 24 }
  0x3f   : > { %473 = dma.done.wait (%p709_p4), [#allocation5], 512   ;;  %p710_p3 = pmov %p709_p4 }
  0x40   : > { %s112_s18 = sand.u32 1, %s486_s20   ;;  %s613_s23 = sshll.u32 %s549_s0, 3 }
  0x41   : > { %475 = vsyncadd (%p710_p3), [#allocation5], 4294966784  ;;  %s273_s25 = sshll.u32 %s112_s18, 3  ;;  %s116_s26 = sld [smem:[#allocation3 + %s613_s23]] }
  0x42   : > { %s124_s30 = sadd.s32 1, %s613_s23  ;;  %s133_s3 = sadd.s32 2, %s613_s23 }
  0x43   : > { %s125_s4 = sld [smem:[#allocation3 + %s124_s30]]  ;;  %s142_s6 = sadd.s32 3, %s613_s23 }
  0x44   : > { %s134_s5 = sld [smem:[#allocation3 + %s133_s3]]  ;;  %s151_s7 = sadd.s32 4, %s613_s23 }
  0x45   : > { %s622_s8 = sld [smem:[#allocation3 + %s142_s6]]  ;;  %s160_s10 = sadd.s32 5, %s613_s23 }
  0x46   : > { %s624_s9 = sld [smem:[#allocation3 + %s151_s7]]  ;;  %s169_s11 = sadd.s32 6, %s613_s23 }
  0x47   : > { %p117_p8 = scmp.gt.s32.totalorder %s116_s26, 0  ;;  %p275_p9 = scmp.lt.s32.totalorder %s116_s26, 31 }
  0x48   : > { %s628_s13 = scalar_lea.vmem [#allocation7], %s273_s25  ;;  %s170_s30 = sld [smem:[#allocation3 + %s169_s11]] }
  0x49   : > { %s718_s26 = smov (!%p117_p8, %s116_s26), 0  ;;  %p126_p12 = scmp.gt.s32.totalorder %s125_s4, 0 }
  0x4a   : > { %p280_p13 = scmp.lt.s32.totalorder %s125_s4, 31  ;;  %s720_s26 = smov (!%p275_p9, %s718_s26), 31 }
  0x4b   : > { %s722_s4 = smov (!%p126_p12, %s125_s4), 0  ;;  %p135_p1 = scmp.gt.s32.totalorder %s134_s5, 0 }
  0x4c   : > { %s121_s12 = scalar_lea.vmem [#allocation4], %s720_s26  ;;  %s724_s4 = smov (!%p280_p13, %s722_s4), 31 }
  0x4d   : > { %v122_v0 = vld [vmem:[%s121_s12] sm:$0x1]  ;;  %s136_s14 = scalar_select %p135_p1, %s134_s5, 0 }
  0x4e   : > { %123 = vst [vmem:[%s628_s13] sm:$0x1] %v122_v0  ;;  %p285_p5 = scmp.lt.s32.totalorder %s134_s5, 31  ;;  %s130_s15 = scalar_lea.vmem [#allocation4], %s724_s4 }
  0x4f   : > { %v131_v1 = vld [vmem:[%s130_s15] sm:$0x1]  ;;  %p144_p6 = scmp.gt.s32.totalorder %s622_s8, 0  ;;  %p290_p7 = scmp.lt.s32.totalorder %s622_s8, 31 }
  0x50   : > { %132 = vst [vmem:[%s628_s13 + $0x1] sm:$0x1] %v131_v1  ;;  %s726_s14 = smov (!%p285_p5, %s136_s14), 31  ;;  %p153_p10 = scmp.gt.s32.totalorder %s624_s9, 0 }
  0x51   : > { %s728_s8 = smov (!%p144_p6, %s622_s8), 0  ;;  %s139_s16 = scalar_lea.vmem [#allocation4], %s726_s14 }
  0x52   : > { %v140_v2 = vld [vmem:[%s139_s16] sm:$0x1]  ;;  %s730_s8 = smov (!%p290_p7, %s728_s8), 31  ;;  %p295_p11 = scmp.lt.s32.totalorder %s624_s9, 31 }
  0x53   : > { %141 = vst [vmem:[%s628_s13 + $0x2] sm:$0x1] %v140_v2  ;;  %s154_s17 = scalar_select %p153_p10, %s624_s9, 0 }
  0x54   : > { %s148_s25 = scalar_lea.vmem [#allocation4], %s730_s8  ;;  %s161_s26 = sld [smem:[#allocation3 + %s160_s10]] }
  0x55   : > { %v149_v3 = vld [vmem:[%s148_s25] sm:$0x1]  ;;  %s732_s17 = smov (!%p295_p11, %s154_s17), 31  ;;  %s178_s3 = sadd.s32 7, %s613_s23 }
  0x56   : > { %150 = vst [vmem:[%s628_s13 + $0x3] sm:$0x1] %v149_v3  ;;  %s157_s4 = scalar_lea.vmem [#allocation4], %s732_s17  ;;  %s179_s5 = sld [smem:[#allocation3 + %s178_s3]] }
  0x57   : > { %v158_v4 = vld [vmem:[%s157_s4] sm:$0x1]  ;;  %s316_s6 = sshll.u32 %s549_s0, 7  ;;  %p171_p4 = scmp.gt.s32.totalorder %s170_s30, 0 }
  0x58   : > { %159 = vst [vmem:[%s628_s13 + $0x4] sm:$0x1] %v158_v4  ;;  %p305_p3 = scmp.lt.s32.totalorder %s170_s30, 31  ;;  %s201_s0 = sshll.u32 %s628_s13, 4  ;;  %s655_s0 = int_to_ptr.vmem [resolvable:$true] %s201_s0 }
  0x59   : > { %s736_s30 = smov (!%p171_p4, %s170_s30), 0  ;;  %s653_s10 = scalar_lea.hbm %s700_s2, %s316_s6 }
  0x5a   : > { %p162_p0 = scmp.gt.s32.totalorder %s161_s26, 0  ;;  %p300_p2 = scmp.lt.s32.totalorder %s161_s26, 31 }
  0x5b   : > { %s740_s30 = smov (!%p305_p3, %s736_s30), 31  ;;  %s188_s12 = scalar_lea.sflag [#allocation6], %s112_s18 }
  0x5c   : > { %s734_s26 = smov (!%p162_p0, %s161_s26), 0  ;;  %p180_p8 = scmp.gt.s32.totalorder %s179_s5, 0 }
  0x5d   : > { %s738_s26 = smov (!%p300_p2, %s734_s26), 31  ;;  %p310_p9 = scmp.lt.s32.totalorder %s179_s5, 31 }
  0x5e   : > { %s166_s23 = scalar_lea.vmem [#allocation4], %s738_s26  ;;  %s175_s7 = scalar_lea.vmem [#allocation4], %s740_s30 }
  0x5f   : > { %v167_v5 = vld [vmem:[%s166_s23] sm:$0x1]  ;;  %s742_s5 = smov (!%p180_p8, %s179_s5), 0  ;;  %s426_s14 = scalar_lea.vmem %s655_s0, 128 }
  0x60   : > { %168 = vst [vmem:[%s628_s13 + $0x5] sm:$0x1] %v167_v5  ;;  %v176_v6 = vld [vmem:[%s175_s7] sm:$0x1]  ;;  %s744_s5 = smov (!%p310_p9, %s742_s5), 31  ;;  %p427_p12 = scmp.ne.s32.totalorder %s655_s0, %s426_s14 }
  0x61   : > { %177 = vst [vmem:[%s628_s13 + $0x6] sm:$0x1] %v176_v6  ;;  %s184_s11 = scalar_lea.vmem [#allocation4], %s744_s5  ;;  %p711_p13 = scmp.ne.s32.totalorder %s704_s28, 0 }
  0x62   : > { %v185_v7 = vld [vmem:[%s184_s11] sm:$0x1]  ;;  %s500_s15 = smov [#allocation7]  }
  0x63   : > { %186 = vst [vmem:[%s628_s13 + $0x7] sm:$0x1] %v185_v7  ;;  %p428_p1 = pnand %p427_p12, %p711_p13  ;;  %s430_s16 = sshll.u32 %s500_s15, 4  ;;  %s431_s16 = int_to_ptr.vmem [resolvable:$false] %s430_s16 }
  0x64   : > { %s432_s17 = scalar_lea.vmem %s431_s16, 256  ;;  %p433_p6 = scmp.lt.s32.totalorder %s655_s0, %s431_s16 }
  0x65   : > { %p429_p5 = pneg %p428_p1  ;;  %p434_p7 = scmp.lt.s32.totalorder %s432_s17, %s426_s14 }
  0x67   : > { %p435_p10 = por %p434_p7, %p433_p6 }
  0x69   : > { %p436_p11 = pnand %p435_p10, %p429_p5 }
  0x6b   : > { %439 = shalt.err (!%p436_p11)
}
  0x6c   : > { %s440_s18 = scalar_lea.hbm %s653_s10, 128  ;;  %s444_s26 = scalar_lea.hbm %s700_s2, 256 }
  0x6d   : > { %p441_p0 = scmp.ne.s32.totalorder %s653_s10, %s440_s18  ;;  %p445_p3 = scmp.lt.u32.totalorder %s653_s10, %s700_s2 }
  0x6e   : > { %p446_p8 = scmp.lt.u32.totalorder %s444_s26, %s440_s18  ;;  %p448_p12 = scmp.lt.u32.totalorder %s440_s18, %s653_s10 }
  0x6f   : > { %p442_p2 = pnand %p441_p0, %p711_p13 }
  0x70   : > { %p447_p9 = por %p446_p8, %p445_p3 }
  0x71   : > { %p443_p4 = pneg %p442_p2 }
  0x72   : > { %p449_p1 = por %p448_p12, %p447_p9 }
  0x74   : > { %p450_p5 = pnand %p449_p1, %p443_p4 }
  0x76   : > { %453 = shalt.err (!%p450_p5)
}
  0x77   : > { %339 = dma.vmem_to_hbm [thread:$0]  (%p711_p13), %s655_s0, 128, %s653_s10, %s188_s12  }
  0x78 PF: > { %p351_p6 = scmp.ge.s32.totalorder %s494_s22, 2  ;;  %s213_s4 = sand.u32 1, %s482_s19  }
  0x79   : > { %p712_p7 = scmp.ne.s32.totalorder %s705_s29, 0  ;;  %s214_s5 = scalar_lea.sflag [#allocation6], %s213_s4 }
  0x7b   : > { %p346_p10 = pnand %p351_p6, %p712_p7 }
  0x7d   : > { %477 = dma.done.wait (!%p346_p10), %s214_s5, 128  }
  0x7e   : > { %479 = vsyncadd (!%p346_p10), %s214_s5, 4294967168  ;;  %p17_p11 = scmp.ge.s32.totalorder %s553_s24, 4   ;;  %s713_s19 = smov %s486_s20 }
  0x7f   : > { %s714_s20 = smov %s490_s21  ;;  %s715_s21 = smov %s564_s27 }
  0x80   : > { %s716_s22 = smov %s553_s24  ;;  %19 = sbr.rel (!%p17_p11) target bundleno = 16 (0x10), region = 69 }
  0x87   :  { %219 = vsyncpa [#allocation5], 1 }
  0x88   :  { %221 = vsyncpa [#allocation5 + $0x1], 1 }
  0x89   :  { %222 = vsyncpa [#allocation6], 1 }
  0x8a   :  { %224 = vsyncpa [#allocation6 + $0x1], 1 }

</bundles_post_ra>
